<compile_context>
chip_gen: v5e
topology: v5e:2x2
jax: 0.10.0
libtpu: 0.0.40
codegen_flags: <defaults>
</compile_context>

<pallas_src>
import jax
import jax.numpy as jnp
from jax.experimental import pallas as pl
from jax.experimental.pallas import tpu as pltpu


def _sublane_multiple(itemsize):
    return {4: 8, 2: 16, 1: 32}.get(itemsize, 8)


def _pick_tile_c(nc, hw, itemsize):
    """Largest channel tile (multiple of the sublane packing) dividing NC,
    targeting ~4 MiB blocks and >= 2 grid steps (v7x megacore / pipelining)."""
    sub = _sublane_multiple(itemsize)
    if nc % sub != 0 or nc <= sub:
        return nc  # full-extent block (always a legal block shape)
    lane_padded_hw = ((hw + 127) // 128) * 128
    row_bytes = lane_padded_hw * itemsize
    target_bytes = 4 * 1024 * 1024
    max_rows = max(sub, target_bytes // row_bytes)
    divisors = [d for d in range(sub, nc + 1, sub) if nc % d == 0]
    cands = [d for d in divisors if d <= max_rows and nc // d >= 2]
    if not cands:
        cands = [d for d in divisors if d <= max_rows] or [sub]
    return max(cands)


def _sigmoid_mul_kernel(gate_ref, x_ref, o_ref):
    # gate_ref: (tile_c, 1); x_ref / o_ref: (tile_c, HW)
    g = jax.nn.sigmoid(gate_ref[...].astype(jnp.float32)).astype(x_ref.dtype)
    o_ref[...] = x_ref[...] * g  # (tile_c, 1) broadcasts over the lane axis


def sigmoid_mul(x301, x297):
    """Computes x297 * sigmoid(x301), broadcasting x301 over spatial dims.

    x301: [N, C, 1, 1]
    x297: [N, C, H, W]
    returns: [N, C, H, W]
    """
    N, C, H, W = x297.shape
    assert x301.shape == (N, C, 1, 1)
    nc, hw = N * C, H * W

    itemsize = jnp.dtype(x297.dtype).itemsize
    tile_c = _pick_tile_c(nc, hw, itemsize)
    num_blocks = nc // tile_c

    gate2d = x301.reshape(nc, 1)
    x2d = x297.reshape(nc, hw)

    # TODO(synk): HW (e.g. 196) is not a multiple of 128, so the output tail
    # lanes use masked stores; a fully lane-dense layout would need a
    # per-element gate gather (extra HBM pass), which is not worth it here.
    out2d = pl.pallas_call(
        _sigmoid_mul_kernel,
        out_shape=jax.ShapeDtypeStruct((nc, hw), x297.dtype),
        grid=(num_blocks,),
        in_specs=[
            pl.BlockSpec((tile_c, 1), lambda i: (i, 0)),
            pl.BlockSpec((tile_c, hw), lambda i: (i, 0)),
        ],
        out_specs=pl.BlockSpec((tile_c, hw), lambda i: (i, 0)),
        compiler_params=pltpu.CompilerParams(
            dimension_semantics=("parallel",),
            vmem_limit_bytes=32 * 1024 * 1024,
        ),
        cost_estimate=pl.CostEstimate(
            flops=nc * hw,
            transcendentals=nc,
            bytes_accessed=(2 * nc * hw + nc) * itemsize,
        ),
    )(gate2d, x2d)

    return out2d.reshape(N, C, H, W)


if __name__ == "__main__":
    key = jax.random.PRNGKey(0)
    k1, k2, k3, k4 = jax.random.split(key, 4)

    # Small shape consistent with the module's [1, 960, 14, 14] / [1, 960, 1, 1].
    N, C, H, W = 1, 64, 14, 14
    x297 = jax.random.normal(k1, (N, C, H, W), dtype=jnp.float32)
    x301 = jax.random.normal(k2, (N, C, 1, 1), dtype=jnp.float32)

    out = jax.block_until_ready(sigmoid_mul(x301, x297))
    ref = x297 * jax.nn.sigmoid(x301)
    assert out.shape == x297.shape
    assert jnp.allclose(out, ref, atol=1e-6, rtol=1e-6)

    # Also exercise the full-extent fallback path (N*C not a multiple of 8).
    N2, C2 = 1, 12
    xb = jax.random.normal(k3, (N2, C2, H, W), dtype=jnp.float32)
    gb = jax.random.normal(k4, (N2, C2, 1, 1), dtype=jnp.float32)
    out2 = jax.block_until_ready(sigmoid_mul(gb, xb))
    ref2 = xb * jax.nn.sigmoid(gb)
    assert jnp.allclose(out2, ref2, atol=1e-6, rtol=1e-6)

    print("KERNEL_OK")
</pallas_src>

<mosaic_0001>
module attributes {stable_mosaic.version = 11 : i64} {
  func.func @_sigmoid_mul_kernel(%arg0: i32, %arg1: memref<32x1xf32, #tpu.memory_space<vmem>>, %arg2: memref<32x196xf32, #tpu.memory_space<vmem>>, %arg3: memref<32x196xf32, #tpu.memory_space<vmem>>) attributes {dimension_semantics = [#tpu.dimension_semantics<parallel>], iteration_bounds = array<i64: 2>, scalar_prefetch = 0 : i64, scratch_operands = 0 : i64, tpu.core_type = #tpu.core_type<tc>, window_params = [{transform_indices = @transform_0, window_bounds = array<i64: 32, 1>}, {transform_indices = @transform_1, window_bounds = array<i64: 32, 196>}, {transform_indices = @transform_2, window_bounds = array<i64: 32, 196>}]} {
    %c0 = arith.constant 0 : index
    %c0_0 = arith.constant 0 : index
    %0 = vector.load %arg1[%c0, %c0_0] : memref<32x1xf32, #tpu.memory_space<vmem>>, vector<32x1xf32>
    %1 = arith.negf %0 : vector<32x1xf32>
    %2 = math.exp %1 : vector<32x1xf32>
    %cst = arith.constant 1.000000e+00 : f32
    %3 = vector.broadcast %cst : f32 to vector<32x1xf32>
    %4 = arith.addf %3, %2 : vector<32x1xf32>
    %5 = arith.divf %3, %4 : vector<32x1xf32>
    %c0_1 = arith.constant 0 : index
    %c0_2 = arith.constant 0 : index
    %6 = vector.load %arg2[%c0_1, %c0_2] : memref<32x196xf32, #tpu.memory_space<vmem>>, vector<32x196xf32>
    %7 = vector.broadcast %5 : vector<32x1xf32> to vector<32x196xf32>
    %8 = arith.mulf %6, %7 : vector<32x196xf32>
    %c0_3 = arith.constant 0 : index
    %c0_4 = arith.constant 0 : index
    %9 = vector.load %arg3[%c0_3, %c0_4] : memref<32x196xf32, #tpu.memory_space<vmem>>, vector<32x196xf32>
    tpu.vector_store %arg3[%c0_3, %c0_4], %8 {strides = array<i32>} : memref<32x196xf32, #tpu.memory_space<vmem>>, vector<32x196xf32>,
    return
  }
  func.func @transform_0(%arg0: i32) -> (i32, i32) {
    %c0_i32 = arith.constant 0 : i32
    %c0_i32_0 = arith.constant 0 : i32
    return %arg0, %c0_i32 : i32, i32
  }
  func.func @transform_1(%arg0: i32) -> (i32, i32) {
    %c0_i32 = arith.constant 0 : i32
    %c0_i32_0 = arith.constant 0 : i32
    return %arg0, %c0_i32 : i32, i32
  }
  func.func @transform_2(%arg0: i32) -> (i32, i32) {
    %c0_i32 = arith.constant 0 : i32
    %c0_i32_0 = arith.constant 0 : i32
    return %arg0, %c0_i32 : i32, i32
  }
}

</mosaic_0001>

<bundles_post_ra>
// kernel: tpu_custom_call.1
= control target key start
LH: loop header
LB: loop body
LE: loop exit
PB: predicated region body
PF: predicated region fallthrough
CT: control target
= control target key end

     0   :  { %7 = vsyncpa [#allocation3], 0  ;;  %s809_s0 = inlined_call_operand.vmem [shape: f32[64,1], index: 0, kind: input, shape index: {}]   ;;  %s810_s1 = inlined_call_operand.hbm [shape: f32[64,196], index: 1, kind: input, shape index: {}]   ;;  %s811_s2 = inlined_call_operand.hbm [shape: f32[64,196], index: 2, kind: output, shape index: {}]  }
   0x1   :  { %9 = vsyncpa [#allocation3 + $0x1], 0 }
   0x2   :  { %10 = vsyncpa [#allocation4], 0 }
   0x3   :  { %12 = vsyncpa [#allocation4 + $0x1], 0  ;;  %s629_s9 = smov 0   ;;  %s631_s10 = smov 0  }
   0x4   :  { %s633_s11 = smov 0   ;;  %s635_s12 = smov 0  }
   0x5 LB: > { %s650_s13 = sadd.s32 4294967295, %s607_s12   ;;  %s416_s14 = sadd.s32 4294967294, %s607_s12   ;;  %s607_s12 = sphi %s635_s12, %s831_s12   ;;  %s603_s11 = sphi %s633_s11, %s830_s11   ;;  %s599_s10 = sphi %s631_s10, %s829_s10   ;;  %s595_s9 = sphi %s629_s9, %s828_s9  }
   0x6   : > { %s654_s15 = sadd.s32 1, %s607_s12   ;;  %s51_s16 = sadd.s32 1, %s603_s11 }
   0x7   : > { %s48_s17 = ssub.s32 %s607_s12, %s654_s15  ;;  %p58_p0 = scmp.ne.s32.totalorder %s603_s11, %s599_s10 }
   0x8   : > { %p49_p1 = scmp.eq.s32.totalorder %s48_s17, 0  ;;  %p59_p2 = scmp.eq.s32.totalorder %s607_s12, 0 }
   0x9   : > { %p64_p3 = scmp.ne.s32.totalorder %s599_s10, %s595_s9  ;;  %p65_p4 = scmp.eq.s32.totalorder %s650_s13, 0 }
   0xa   : > { %s666_s18 = scalar_select %p49_p1, %s603_s11, %s51_s16  }
   0xb   : > { %p668_p5 = por %p59_p2, %p58_p0  ;;  %p672_p6 = por %p65_p4, %p64_p3 }
   0xc   : > { %p88_p7 = scmp.eq.s32.totalorder %s650_s13, 1  ;;  %p94_p8 = scmp.eq.s32.totalorder %s416_s14, 1 }
   0xd   : > { %p454_p10 = scmp.lt.s32.totalorder %s607_s12, 2  ;;  %s123_s23 = sand.u32 1, %s603_s11  }
   0xe   : > { %p679_p11 = por %p88_p7, %p58_p0  ;;  %p683_p12 = por %p94_p8, %p64_p3 }
   0xf   : > { %s439_s24 = sshll.u32 %s607_s12, 6  ;;  %s419_s25 = sshll.u32 %s123_s23, 6 }
  0x10   : > { %s133_s28 = scalar_lea.hbm %s810_s1, %s439_s24  ;;  %s127_s30 = scalar_lea.vmem [#allocation2], %s419_s25 }
  0x11   : > { %s134_s29 = sshll.u32 %s133_s28, 4  ;;  %s136_s3 = sshll.u32 %s127_s30, 4  ;;  %s135_s29 = int_to_ptr.hbm [resolvable:$true] %s134_s29  ;;  %s137_s3 = int_to_ptr.vmem [resolvable:$true] %s136_s3 }
  0x12   : > { %p694_p13 = pnand %p454_p10, %p668_p5  ;;  %p423_p0 = scmp.ge.s32.totalorder %s607_s12, 1 }
  0x13   : > { %p144_p1 = scmp.lt.s32.totalorder %s607_s12, 3  ;;  %s124_s5 = scalar_lea.sflag [#allocation3], %s123_s23 }
  0x14   : > { %s511_s6 = sshra.s32 %s135_s29, 4  ;;  %p515_p3 = pneg %p694_p13  ;;  %s512_s6 = int_to_ptr.hbm [resolvable:$true] %s511_s6 }
  0x15   : > { %s513_s7 = scalar_lea.hbm %s512_s6, 64  ;;  %s518_s16 = scalar_lea.hbm %s810_s1, 128 }
  0x16   : > { %p514_p2 = scmp.ne.s32.totalorder %s512_s6, %s513_s7  ;;  %p519_p5 = scmp.lt.s32.totalorder %s512_s6, %s810_s1 }
  0x17   : > { %p520_p8 = scmp.lt.s32.totalorder %s518_s16, %s513_s7 }
  0x18   : > { %p516_p4 = pnand %p515_p3, %p514_p2 }
  0x19   : > { %p521_p10 = por %p520_p8, %p519_p5 }
  0x1a   : > { %p517_p7 = pneg %p516_p4 }
  0x1c   : > { %p522_p9 = pnand %p521_p10, %p517_p7 }
  0x1e   : > { %525 = shalt.err (!%p522_p9)
}
  0x1f   : > { %s609_s23 = smov 256   ;;  %s610_s24 = smov 16  }
  0x20   : > { %449 = dma.hbm_to_vmem [thread:$0]  (!%p694_p13), %s135_s29, 1024, %s137_s3, %s124_s5, %s609_s23, %s609_s23, %s610_s24  }
  0x21   : > { %p145_p2 = pnand %p423_p0, %p144_p1 }
  0x22   : > { %s715_s25 = sand.u32 (!%p145_p2), 1, %s599_s10  }
  0x23   : > { %148 = sbr.rel (%p145_p2) target bundleno = 208 (0xd0), region = 28  ;;  %s424_s26 = sshll.u32 (!%p145_p2), %s715_s25, 6 }
  0x24   : > { %s151_s27 = scalar_lea.sflag (!%p145_p2), [#allocation3], %s715_s25  ;;  %s721_s28 = scalar_lea.vmem (!%p145_p2), [#allocation2], %s424_s26 }
  0x28   : > { %586 = dma.done.wait (%p672_p6), %s151_s27, 1024  }
  0x29   : > { %588 = vsyncadd (%p672_p6), %s151_s27, 4294966272  ;;  %s426_s29 = sshll.u32 %s650_s13, 2  ;;  %v611_v0 = vmov 0   ;;  %v273_v62 = vld [vmem:[%s721_s28 + $0x20] sm:$0xff]  ;;  %v274_v63 = vld [vmem:[%s721_s28 + $0x28] sm:$0xff]  ;;  %s441_s20 = sshll.u32 %s650_s13, 6 }
  0x2a   : > { %494 = vset.pattern.permute.xlu1 %v611_v0  ;;  %493 = vset.pattern.permute.xlu0 %v611_v0  ;;  %p182_p9 = scmp.lt.s32.totalorder %s426_s29, 7  ;;  %v269_v0 = vld [vmem:[%s721_s28] sm:$0xff]  ;;  %s180_s6 = scalar_lea.vmem [#allocation5], %s424_s26 }
  0x2b   : > { %s327_s14 = scalar_lea.hbm %s811_s2, %s441_s20  ;;  %s328_s16 = sshll.u32 %s180_s6, 4  ;;  %s329_s16 = int_to_ptr.vmem [resolvable:$true] %s328_s16 }
  0x2c   : > { %s833_s29 = smov (!%p182_p9, %s426_s29), 7  ;;  %s330_s13 = sshll.u32 %s327_s14, 4  ;;  %s331_s13 = int_to_ptr.hbm [resolvable:$true] %s330_s13 }
  0x2d   : > { %s427_s30 = sshll.u32 %s833_s29, 3  ;;  %s315_s17 = scalar_lea.sflag [#allocation4], %s715_s25 }
  0x2e   : > { %s185_s5 = scalar_lea.vmem %s809_s0, %s427_s30  ;;  %s555_s19 = sshra.s32 %s331_s13, 4  ;;  %s556_s19 = int_to_ptr.hbm [resolvable:$true] %s555_s19 }
  0x2f   : > { %v191_v1 = vld [vmem:[%s185_s5 + $0x10] sm:$0xff]  ;;  %v189_v2 = vld [vmem:[%s185_s5] sm:$0xff]  ;;  %v192_v3 = vld [vmem:[%s185_s5 + $0x18] sm:$0xff]  ;;  %s557_s23 = scalar_lea.hbm %s556_s19, 64  ;;  %s561_s27 = scalar_lea.hbm %s811_s2, 128 }
  0x30   : > { %v430_v4 = vmul.f32 -1.442695, %v191_v1  ;;  %v428_v5 = vmul.f32 -1.442695, %v189_v2  ;;  %v431_v6 = vmul.f32 -1.442695, %v192_v3  ;;  %p558_p6 = scmp.ne.s32.totalorder %s556_s19, %s557_s23  ;;  %p562_p1 = scmp.lt.s32.totalorder %s556_s19, %s811_s2 }
  0x31   : > { %v190_v7 = vld [vmem:[%s185_s5 + $0x8] sm:$0xff]  ;;  %p563_p3 = scmp.lt.s32.totalorder %s561_s27, %s557_s23 }
  0x32   : > { %495 = vpow2.f32 %v430_v4  ;;  %v429_v8 = vmul.f32 -1.442695, %v190_v7  ;;  %v270_v1 = vld [vmem:[%s721_s28 + $0x8] sm:$0xff]  ;;  %p559_p13 = pnand %p558_p6, %p679_p11 }
  0x33   : > { %497 = vpow2.f32 %v428_v5  ;;  %p564_p4 = por %p563_p3, %p562_p1 }
  0x34   : > { %499 = vpow2.f32 %v431_v6  ;;  %p560_p0 = pneg %p559_p13 }
  0x35   : > { %501 = vpow2.f32 %v429_v8  ;;  %v275_v8 = vld [vmem:[%s721_s28 + $0x30] sm:$0xff] }
  0x36   : > { %p565_p7 = pnand %p564_p4, %p560_p0 }
  0x38   : > { %v496_v9 = vpop.eup %495 }
  0x39   : > { %v498_v10 = vpop.eup %497  ;;  %v207_v11 = vadd.f32 1.0, %v496_v9  ;;  %v276_v9 = vld [vmem:[%s721_s28 + $0x38] sm:$0xff] }
  0x3a   : > { %v500_v12 = vpop.eup %499  ;;  %v205_v13 = vadd.f32 1.0, %v498_v10  ;;  %v271_v10 = vld [vmem:[%s721_s28 + $0x10] sm:$0xff] }
  0x3b   : > { %v502_v14 = vpop.eup %501  ;;  %503 = vrcp.f32 %v207_v11  ;;  %v208_v15 = vadd.f32 1.0, %v500_v12  ;;  %v248_v18 = vand.u32 2147483647, %v207_v11  ;;  %v250_v21 = vand.u32 2147483648, %v207_v11 }
  0x3c   : > { %505 = vrcp.f32 %v205_v13  ;;  %v206_v16 = vadd.f32 1.0, %v502_v14  ;;  %v218_v22 = vand.u32 2147483647, %v205_v13  ;;  %v220_v24 = vand.u32 2147483648, %v205_v13 }
  0x3d   : > { %507 = vrcp.f32 %v208_v15  ;;  %vm244_vm0 = vweird.f32 %v207_v11  ;;  %vm731_vm2 = vcmp.eq.f32.partialorder %v248_v18, 8.507059e+37  ;;  %vm214_vm3 = vweird.f32 %v205_v13 }
  0x3e   : > { %509 = vrcp.f32 %v206_v16  ;;  %v251_v31 = vor.u32 1.1754944e-38, %v250_v21  ;;  %vm735_vm5 = vcmp.eq.f32.partialorder %v218_v22, 8.507059e+37  ;;  %v221_v36 = vor.u32 1.1754944e-38, %v220_v24 }
  0x3f   : > { %vm259_vm7 = vweird.f32 %v208_v15  ;;  %v265_v41 = vand.u32 2147483648, %v208_v15  ;;  %vm229_vm10 = vweird.f32 %v206_v16  ;;  %v263_v46 = vand.u32 2147483647, %v208_v15 }
  0x40   : > { %v235_v47 = vand.u32 2147483648, %v206_v16  ;;  %v233_v52 = vand.u32 2147483647, %v206_v16 }
  0x41   : > { %v504_v17 = vpop.eup %503  ;;  %v266_v55 = vor.u32 1.1754944e-38, %v265_v41  ;;  %vm264_vm14 = vcmp.eq.f32.partialorder %v263_v46, 8.507059e+37 }
  0x42   : > { %v506_v19 = vpop.eup %505  ;;  %v240_v20 = vmul.f32 %v504_v17, %v207_v11  ;;  %vm245_vm1 = vweird.f32 %v504_v17  ;;  %v236_v58 = vor.u32 1.1754944e-38, %v235_v47  ;;  %vm234_vm15 = vcmp.eq.f32.partialorder %v233_v52, 8.507059e+37  ;;  %v272_v11 = vld [vmem:[%s721_s28 + $0x18] sm:$0xff] }
  0x43   : > { %v210_v23 = vmul.f32 %v506_v19, %v205_v13  ;;  %v508_v26 = vpop.eup %507  ;;  %vm215_vm4 = vweird.f32 %v506_v19  ;;  %vm739_vm6 = vmor %vm244_vm0, %vm245_vm1  ;;  %vm306_vm0 = vcmask 556032  }
  0x44   : > { %v241_v25 = vsub.f32 1.0, %v240_v20  ;;  %v510_v29 = vpop.eup %509  ;;  %v255_v33 = vmul.f32 %v508_v26, %v208_v15  ;;  %vm743_vm8 = vmor %vm214_vm3, %vm215_vm4  ;;  %vm260_vm9 = vweird.f32 %v508_v26 }
  0x45   : > { %v211_v28 = vsub.f32 1.0, %v210_v23  ;;  %v225_v37 = vmul.f32 %v510_v29, %v206_v16  ;;  %vm230_vm11 = vweird.f32 %v510_v29  ;;  %vm754_vm12 = vmor %vm259_vm7, %vm260_vm9 }
  0x46   : > { %v242_v30 = vmul.f32 %v504_v17, %v241_v25  ;;  %v256_v40 = vsub.f32 1.0, %v255_v33  ;;  %vm231_vm13 = vmor %vm229_vm10, %vm230_vm11 }
  0x47   : > { %v212_v35 = vmul.f32 %v506_v19, %v211_v28  ;;  %v226_v43 = vsub.f32 1.0, %v225_v37 }
  0x48   : > { %v243_v38 = vadd.f32 %v504_v17, %v242_v30  ;;  %v257_v45 = vmul.f32 %v508_v26, %v256_v40 }
  0x49   : > { %v213_v42 = vadd.f32 %v506_v19, %v212_v35  ;;  %v227_v51 = vmul.f32 %v510_v29, %v226_v43 }
  0x4a   : > { %v247_v44 = vsel %vm739_vm6, %v504_v17, %v243_v38  ;;  %v258_v54 = vadd.f32 %v508_v26, %v257_v45 }
  0x4b   : > { %v252_v48 = vsel %vm731_vm2, %v251_v31, %v247_v44  ;;  %v217_v49 = vsel %vm743_vm8, %v506_v19, %v213_v42  ;;  %v228_v56 = vadd.f32 %v510_v29, %v227_v51 }
  0x4c   : > { %289 = vperm.xlu1 %494, %v252_v48   ;;  %v222_v53 = vsel %vm735_vm5, %v221_v36, %v217_v49  ;;  %v262_v57 = vsel %vm754_vm12, %v508_v26, %v258_v54 }
  0x4d   : > { %279 = vperm.xlu0 %493, %v222_v53   ;;  %v232_v59 = vsel %vm231_vm13, %v510_v29, %v228_v56  ;;  %v267_v60 = vsel %vm264_vm14, %v266_v55, %v262_v57 }
  0x4e   : > { %v237_v61 = vsel %vm234_vm15, %v236_v58, %v232_v59 }
  0x54   : > { %294 = vperm.xlu1 %494, %v267_v60  }
  0x55   : > { %284 = vperm.xlu0 %493, %v237_v61  }
  0xbe   : > { %v290_v2 = vpop.permute.xlu1 %289 }
  0xbf   : > { %v301_v3 = vmul.f32 %v290_v2, %v273_v62  ;;  %v302_v4 = vmul.f32 %v290_v2, %v274_v63  ;;  %v280_v5 = vpop.permute.xlu0 %279 }
  0xc0   : > { %v297_v6 = vmul.f32 %v280_v5, %v269_v0  ;;  %v298_v7 = vmul.f32 %v280_v5, %v270_v1 }
  0xc1   : > { %310 = vst [vmem:[%s180_s6 + $0x20] sm:$0xff] %v301_v3 }
  0xc2   : > { %311 = vst.msk [vmem:[%s180_s6 + $0x28] sm:$0xff] %vm306_vm0, %v302_v4 }
  0xc3   : > { %305 = vst [vmem:[%s180_s6] sm:$0xff] %v297_v6 }
  0xc4   : > { %307 = vst.msk [vmem:[%s180_s6 + $0x8] sm:$0xff] %vm306_vm0, %v298_v7 }
  0xc6   : > { %v295_v12 = vpop.permute.xlu1 %294 }
  0xc7   : > { %v303_v13 = vmul.f32 %v295_v12, %v275_v8  ;;  %v304_v14 = vmul.f32 %v295_v12, %v276_v9  ;;  %v285_v15 = vpop.permute.xlu0 %284 }
  0xc8   : > { %v299_v16 = vmul.f32 %v285_v15, %v271_v10  ;;  %v300_v17 = vmul.f32 %v285_v15, %v272_v11 }
  0xc9   : > { %312 = vst [vmem:[%s180_s6 + $0x30] sm:$0xff] %v303_v13 }
  0xca   : > { %313 = vst.msk [vmem:[%s180_s6 + $0x38] sm:$0xff] %vm306_vm0, %v304_v14 }
  0xcb   : > { %308 = vst [vmem:[%s180_s6 + $0x10] sm:$0xff] %v299_v16 }
  0xcc   : > { %309 = vst.msk [vmem:[%s180_s6 + $0x18] sm:$0xff] %vm306_vm0, %v300_v17 }
  0xcd   : > { %568 = shalt.err (!%p565_p7)
}
  0xce   : > { %s612_s25 = smov 256   ;;  %s613_s30 = smov 16  }
  0xcf   : > { %444 = dma.vmem_to_hbm [thread:$0]  (%p679_p11), %s329_s16, 1024, %s331_s13, %s315_s17, %s612_s25, %s612_s25, %s613_s30  }
  0xd0 PF: > { %s345_s3 = sand.u32 1, %s595_s9   ;;  %p827_p5 = scmp.ge.s32.totalorder %s607_s12, 2 }
  0xd1   : > { %s346_s4 = scalar_lea.sflag [#allocation4], %s345_s3 }
  0xd2   : > { %p451_p8 = pnand %p827_p5, %p683_p12 }
  0xd4   : > { %p452_p10 = pneg %p451_p8 }
  0xd6   : > { %590 = dma.done.wait (%p452_p10), %s346_s4, 1024  }
  0xd7   : > { %592 = vsyncadd (%p452_p10), %s346_s4, 4294966272  ;;  %p15_p2 = scmp.ge.s32.totalorder %s654_s15, 4   ;;  %s828_s9 = smov %s599_s10 }
  0xd8   : > { %s829_s10 = smov %s603_s11  ;;  %s830_s11 = smov %s666_s18 }
  0xd9   : > { %s831_s12 = smov %s654_s15  ;;  %17 = sbr.rel (!%p15_p2) target bundleno = 5 (0x5), region = 76 }
  0xde   :  { %352 = vsyncpa [#allocation3], 1 }
  0xdf   :  { %354 = vsyncpa [#allocation3 + $0x1], 1 }
  0xe0   :  { %355 = vsyncpa [#allocation4], 1 }
  0xe1   :  { %357 = vsyncpa [#allocation4 + $0x1], 1 }

</bundles_post_ra>
